<compile_context>
chip_gen: v6e
topology: v6e:2x2x1
jax: 0.10.0
libtpu: 0.0.40
codegen_flags: <defaults>
</compile_context>

<pallas_src>
import math
import functools

import jax
import jax.numpy as jnp
from jax.experimental import pallas as pl
from jax.experimental.pallas import tpu as pltpu


def _round_up(x, m):
    return ((x + m - 1) // m) * m


# --------------------------------------------------------------------------
# Stage 1: support = X @ W   (computed once; tiled rows / cols / contraction)
# --------------------------------------------------------------------------
def _support_kernel(x_ref, w_ref, o_ref, acc_ref):
    k = pl.program_id(2)

    @pl.when(k == 0)
    def _():
        acc_ref[...] = jnp.zeros_like(acc_ref)

    acc_ref[...] += jnp.dot(
        x_ref[...], w_ref[...], preferred_element_type=jnp.float32
    )

    @pl.when(k == pl.num_programs(2) - 1)
    def _():
        o_ref[...] = acc_ref[...].astype(o_ref.dtype)


# --------------------------------------------------------------------------
# Stage 2: out = adj @ support + bias   (tiled contraction + f32 accumulator)
#   adj arrives unpadded / un-cast straight from HBM; ragged contraction
#   columns are masked here so padding garbage never reaches the MXU result.
# --------------------------------------------------------------------------
def _aggregate_kernel(adj_ref, sup_ref, b_ref, o_ref, acc_ref, *,
                      n_valid, k_tile, compute_dtype, ragged):
    k = pl.program_id(2)

    @pl.when(k == 0)
    def _():
        acc_ref[...] = jnp.zeros_like(acc_ref)

    adj_tile = adj_ref[...]
    if ragged:
        # Global column index of each lane; zero out columns >= n_valid.
        col = k * k_tile + jax.lax.broadcasted_iota(
            jnp.int32, (1, adj_tile.shape[1]), 1
        )
        adj_tile = jnp.where(col < n_valid, adj_tile, 0)

    acc_ref[...] += jnp.dot(
        adj_tile.astype(compute_dtype), sup_ref[...],
        preferred_element_type=jnp.float32,
    )

    @pl.when(k == pl.num_programs(2) - 1)
    def _():
        o_ref[...] = (acc_ref[...] + b_ref[...]).astype(o_ref.dtype)


@functools.partial(
    jax.jit,
    static_argnames=("row_tile", "col_tile", "k_tile", "in_f_tile",
                     "compute_dtype"),
)
def graph_convolution(
    x,
    adj,
    weight,
    bias=None,
    *,
    row_tile=256,
    col_tile=512,
    k_tile=1024,
    in_f_tile=512,
    compute_dtype=jnp.bfloat16,
):
    """Pallas GCN forward: adj @ (x @ weight) + bias."""
    n, in_f = x.shape
    in_f_w, out_f = weight.shape
    assert in_f == in_f_w
    assert adj.shape == (n, n)
    out_dtype = x.dtype

    if bias is None:
        bias = jnp.zeros((out_f,), jnp.float32)

    # ---- tile sizes: lane dims -> multiples of 128, sublane dims -> of 8 ----
    k_tile = min(k_tile, _round_up(n, 128))          # adj lane / support rows
    col_tile = min(col_tile, _round_up(out_f, 128))  # lane-dense output
    row_tile = min(row_tile, _round_up(n, 8))        # adj / output row tile
    in_f_tile = min(in_f_tile, _round_up(in_f, 128))

    n_sup = _round_up(n, k_tile)        # support rows (zero rows past n)
    out_f_p = _round_up(out_f, col_tile)
    in_f_p = _round_up(in_f, in_f_tile)

    # ---- only the SMALL operands get padded / cast in the wrapper ----
    # (The N x N adjacency — the dominant HBM traffic — is untouched.)
    x_p = jnp.pad(x, ((0, n_sup - n), (0, in_f_p - in_f))).astype(compute_dtype)
    w_p = jnp.pad(
        weight, ((0, in_f_p - in_f), (0, out_f_p - out_f))
    ).astype(compute_dtype)
    b_p = jnp.pad(
        bias.reshape(1, out_f).astype(jnp.float32),
        ((0, 0), (0, out_f_p - out_f)),
    )

    cd_size = jnp.dtype(compute_dtype).itemsize

    # ---- stage 1: support = X @ W (once) ----
    support = pl.pallas_call(
        _support_kernel,
        out_shape=jax.ShapeDtypeStruct((n_sup, out_f_p), compute_dtype),
        grid_spec=pltpu.PrefetchScalarGridSpec(
            num_scalar_prefetch=0,
            grid=(n_sup // k_tile, out_f_p // col_tile, in_f_p // in_f_tile),
            in_specs=[
                pl.BlockSpec((k_tile, in_f_tile), lambda i, j, k: (i, k)),
                pl.BlockSpec((in_f_tile, col_tile), lambda i, j, k: (k, j)),
            ],
            out_specs=pl.BlockSpec((k_tile, col_tile), lambda i, j, k: (i, j)),
            scratch_shapes=[pltpu.VMEM((k_tile, col_tile), jnp.float32)],
        ),
        compiler_params=pltpu.CompilerParams(
            dimension_semantics=("parallel", "parallel", "arbitrary"),
        ),
        cost_estimate=pl.CostEstimate(
            flops=2 * n_sup * in_f_p * out_f_p,
            transcendentals=0,
            bytes_accessed=(n_sup * in_f_p + in_f_p * out_f_p
                            + n_sup * out_f_p) * cd_size,
        ),
    )(x_p, w_p)

    # ---- stage 2: out = adj @ support + bias ----
    n_i = pl.cdiv(n, row_tile)
    n_j = out_f_p // col_tile
    n_k = pl.cdiv(n, k_tile)
    agg_kernel = functools.partial(
        _aggregate_kernel,
        n_valid=n,
        k_tile=k_tile,
        compute_dtype=compute_dtype,
        ragged=(n % k_tile != 0),
    )

    out_p = pl.pallas_call(
        agg_kernel,
        out_shape=jax.ShapeDtypeStruct((n, out_f_p), out_dtype),
        grid_spec=pltpu.PrefetchScalarGridSpec(
            num_scalar_prefetch=0,
            grid=(n_i, n_j, n_k),
            in_specs=[
                # adjacency row/contraction tile (native dtype, no wrapper copy)
                pl.BlockSpec((row_tile, k_tile), lambda i, j, k: (i, k)),
                # matching support contraction/col tile
                pl.BlockSpec((k_tile, col_tile), lambda i, j, k: (k, j)),
                # bias column tile (only consumed at finalize)
                pl.BlockSpec((1, col_tile), lambda i, j, k: (0, j)),
            ],
            out_specs=pl.BlockSpec((row_tile, col_tile), lambda i, j, k: (i, j)),
            scratch_shapes=[pltpu.VMEM((row_tile, col_tile), jnp.float32)],
        ),
        compiler_params=pltpu.CompilerParams(
            dimension_semantics=("parallel", "parallel", "arbitrary"),
        ),
        cost_estimate=pl.CostEstimate(
            flops=2 * n * n * out_f_p,
            transcendentals=0,
            bytes_accessed=n * n * adj.dtype.itemsize * n_j
            + n_sup * out_f_p * cd_size * n_i
            + n * out_f_p * jnp.dtype(out_dtype).itemsize
            + out_f_p * 4,
        ),
    )(adj, support, b_p)

    if out_f_p == out_f:
        return out_p
    return out_p[:, :out_f]


def _init_params(key, in_features, out_features):
    """Deterministic init matching GraphConvolution.reset_parameters()."""
    stdv = 1.0 / math.sqrt(out_features)
    kw, kb = jax.random.split(key)
    weight = jax.random.uniform(
        kw, (in_features, out_features), jnp.float32, minval=-stdv, maxval=stdv
    )
    bias = jax.random.uniform(
        kb, (out_features,), jnp.float32, minval=-stdv, maxval=stdv
    )
    return weight, bias


if __name__ == "__main__":
    # Small example shapes: 64 graph nodes, 32 -> 48 features.
    N, IN_F, OUT_F = 64, 32, 48

    key = jax.random.PRNGKey(0)
    k_x, k_adj, k_params = jax.random.split(key, 3)

    x = jax.random.normal(k_x, (N, IN_F), dtype=jnp.float32)

    # Deterministic row-normalized dense adjacency (self-loops + random edges).
    raw = jax.random.uniform(k_adj, (N, N), dtype=jnp.float32)
    adj_mask = (raw > 0.5).astype(jnp.float32) + jnp.eye(N, dtype=jnp.float32)
    adj = adj_mask / jnp.sum(adj_mask, axis=1, keepdims=True)

    weight, bias = _init_params(k_params, IN_F, OUT_F)

    out = graph_convolution(x, adj, weight, bias)
    out = jax.block_until_ready(out)
    assert out.shape == (N, OUT_F)

    # Reference matching kernel numerics (bf16 MXU inputs, f32 accumulation).
    x_c, w_c, adj_c = (a.astype(jnp.bfloat16) for a in (x, weight, adj))
    sup_ref = jnp.dot(x_c, w_c, preferred_element_type=jnp.float32).astype(
        jnp.bfloat16
    )
    ref_bf16 = jnp.dot(adj_c, sup_ref, preferred_element_type=jnp.float32) + bias
    assert jnp.allclose(out, ref_bf16.astype(out.dtype), atol=1e-2, rtol=1e-2)

    # Loose sanity check against the full-f32 math as well.
    ref_f32 = adj @ (x @ weight) + bias
    assert jnp.allclose(out, ref_f32, atol=5e-2, rtol=5e-2)

    print("KERNEL_OK")
</pallas_src>

<mosaic_0001>
module attributes {stable_mosaic.version = 11 : i64} {
  func.func @_support_kernel(%arg0: i32, %arg1: i32, %arg2: i32, %arg3: memref<128x128xbf16, #tpu.memory_space<vmem>>, %arg4: memref<128x128xbf16, #tpu.memory_space<vmem>>, %arg5: memref<128x128xbf16, #tpu.memory_space<vmem>>, %arg6: memref<128x128xf32, #tpu.memory_space<vmem>>) attributes {dimension_semantics = [#tpu.dimension_semantics<parallel>, #tpu.dimension_semantics<parallel>, #tpu.dimension_semantics<arbitrary>], iteration_bounds = array<i64: 1, 1, 1>, scalar_prefetch = 0 : i64, scratch_operands = 1 : i64, tpu.core_type = #tpu.core_type<tc>, window_params = [{transform_indices = @transform_0, window_bounds = array<i64: 128, 128>}, {transform_indices = @transform_1, window_bounds = array<i64: 128, 128>}, {transform_indices = @transform_2, window_bounds = array<i64: 128, 128>}]} {
    %c0_i32 = arith.constant 0 : i32
    %0 = arith.cmpi eq, %arg2, %c0_i32 : i32
    %1 = arith.extui %0 : i1 to i32
    %c0_i32_0 = arith.constant 0 : i32
    %2 = arith.cmpi ne, %1, %c0_i32_0 : i32
    scf.if %2 {
      %cst_10 = arith.constant 0.000000e+00 : f32
      %12 = vector.broadcast %cst_10 : f32 to vector<128x128xf32>
      %c0_11 = arith.constant 0 : index
      %c0_12 = arith.constant 0 : index
      %13 = vector.load %arg6[%c0_11, %c0_12] : memref<128x128xf32, #tpu.memory_space<vmem>>, vector<128x128xf32>
      tpu.vector_store %arg6[%c0_11, %c0_12], %12 {strides = array<i32>} : memref<128x128xf32, #tpu.memory_space<vmem>>, vector<128x128xf32>,
    } else {
    }
    %c0 = arith.constant 0 : index
    %c0_1 = arith.constant 0 : index
    %3 = vector.load %arg6[%c0, %c0_1] : memref<128x128xf32, #tpu.memory_space<vmem>>, vector<128x128xf32>
    %c0_2 = arith.constant 0 : index
    %c0_3 = arith.constant 0 : index
    %4 = vector.load %arg3[%c0_2, %c0_3] : memref<128x128xbf16, #tpu.memory_space<vmem>>, vector<128x128xbf16>
    %c0_4 = arith.constant 0 : index
    %c0_5 = arith.constant 0 : index
    %5 = vector.load %arg4[%c0_4, %c0_5] : memref<128x128xbf16, #tpu.memory_space<vmem>>, vector<128x128xbf16>
    %cst = arith.constant dense<0.000000e+00> : vector<128x128xf32>
    %6 = tpu.matmul %4, %5, %cst {dimension_numbers = #tpu.dot_dimension_numbers<[1], [0], [0], [1], [0, 0, 1, 1], [], []>} : vector<128x128xbf16>, vector<128x128xbf16>, vector<128x128xf32> -> vector<128x128xf32>
    %7 = arith.addf %3, %6 : vector<128x128xf32>
    %c0_6 = arith.constant 0 : index
    %c0_7 = arith.constant 0 : index
    %8 = vector.load %arg6[%c0_6, %c0_7] : memref<128x128xf32, #tpu.memory_space<vmem>>, vector<128x128xf32>
    tpu.vector_store %arg6[%c0_6, %c0_7], %7 {strides = array<i32>} : memref<128x128xf32, #tpu.memory_space<vmem>>, vector<128x128xf32>,
    %c0_i32_8 = arith.constant 0 : i32
    %9 = arith.cmpi eq, %arg2, %c0_i32_8 : i32
    %10 = arith.extui %9 : i1 to i32
    %c0_i32_9 = arith.constant 0 : i32
    %11 = arith.cmpi ne, %10, %c0_i32_9 : i32
    scf.if %11 {
      %c0_10 = arith.constant 0 : index
      %c0_11 = arith.constant 0 : index
      %12 = vector.load %arg6[%c0_10, %c0_11] : memref<128x128xf32, #tpu.memory_space<vmem>>, vector<128x128xf32>
      %13 = arith.truncf %12 : vector<128x128xf32> to vector<128x128xbf16>
      %c0_12 = arith.constant 0 : index
      %c0_13 = arith.constant 0 : index
      %14 = vector.load %arg5[%c0_12, %c0_13] : memref<128x128xbf16, #tpu.memory_space<vmem>>, vector<128x128xbf16>
      tpu.vector_store %arg5[%c0_12, %c0_13], %13 {strides = array<i32>} : memref<128x128xbf16, #tpu.memory_space<vmem>>, vector<128x128xbf16>,
    } else {
    }
    return
  }
  func.func @transform_0(%arg0: i32, %arg1: i32, %arg2: i32) -> (i32, i32) {
    %c0_i32 = arith.constant 0 : i32
    return %arg0, %arg2 : i32, i32
  }
  func.func @transform_1(%arg0: i32, %arg1: i32, %arg2: i32) -> (i32, i32) {
    %c0_i32 = arith.constant 0 : i32
    return %arg2, %arg1 : i32, i32
  }
  func.func @transform_2(%arg0: i32, %arg1: i32, %arg2: i32) -> (i32, i32) {
    %c0_i32 = arith.constant 0 : i32
    return %arg0, %arg1 : i32, i32
  }
}

module attributes {stable_mosaic.version = 11 : i64} {
  func.func @_aggregate_kernel(%arg0: i32, %arg1: i32, %arg2: i32, %arg3: memref<64x128xf32, #tpu.memory_space<vmem>>, %arg4: memref<128x128xbf16, #tpu.memory_space<vmem>>, %arg5: memref<1x128xf32, #tpu.memory_space<vmem>>, %arg6: memref<64x128xf32, #tpu.memory_space<vmem>>, %arg7: memref<64x128xf32, #tpu.memory_space<vmem>>) attributes {dimension_semantics = [#tpu.dimension_semantics<parallel>, #tpu.dimension_semantics<parallel>, #tpu.dimension_semantics<arbitrary>], iteration_bounds = array<i64: 1, 1, 1>, scalar_prefetch = 0 : i64, scratch_operands = 1 : i64, tpu.core_type = #tpu.core_type<tc>, window_params = [{transform_indices = @transform_0, window_bounds = array<i64: 64, 128>}, {transform_indices = @transform_1, window_bounds = array<i64: 128, 128>}, {transform_indices = @transform_2, window_bounds = array<i64: 1, 128>}, {transform_indices = @transform_3, window_bounds = array<i64: 64, 128>}]} {
    %c0_i32 = arith.constant 0 : i32
    %0 = arith.cmpi eq, %arg2, %c0_i32 : i32
    %1 = arith.extui %0 : i1 to i32
    %c0_i32_0 = arith.constant 0 : i32
    %2 = arith.cmpi ne, %1, %c0_i32_0 : i32
    scf.if %2 {
      %cst_11 = arith.constant 0.000000e+00 : f32
      %24 = vector.broadcast %cst_11 : f32 to vector<64x128xf32>
      %c0_12 = arith.constant 0 : index
      %c0_13 = arith.constant 0 : index
      %25 = vector.load %arg7[%c0_12, %c0_13] : memref<64x128xf32, #tpu.memory_space<vmem>>, vector<64x128xf32>
      tpu.vector_store %arg7[%c0_12, %c0_13], %24 {strides = array<i32>} : memref<64x128xf32, #tpu.memory_space<vmem>>, vector<64x128xf32>,
    } else {
    }
    %c0 = arith.constant 0 : index
    %c0_1 = arith.constant 0 : index
    %3 = vector.load %arg3[%c0, %c0_1] : memref<64x128xf32, #tpu.memory_space<vmem>>, vector<64x128xf32>
    %c128_i32 = arith.constant 128 : i32
    %4 = arith.muli %arg2, %c128_i32 : i32
    %5 = tpu.iota {dimensions = array<i32: 1>} : vector<1x128xi32>
    %6 = vector.broadcast %4 : i32 to vector<1x128xi32>
    %7 = arith.addi %6, %5 : vector<1x128xi32>
    %c64_i32 = arith.constant 64 : i32
    %8 = vector.broadcast %c64_i32 : i32 to vector<1x128xi32>
    %9 = arith.cmpi slt, %7, %8 : vector<1x128xi32>
    %c0_i32_2 = arith.constant 0 : i32
    %10 = arith.sitofp %c0_i32_2 : i32 to f32
    %11 = vector.shape_cast %9 : vector<1x128xi1> to vector<1x128xi1>
    %12 = vector.broadcast %11 : vector<1x128xi1> to vector<64x128xi1>
    %13 = vector.broadcast %10 : f32 to vector<64x128xf32>
    %14 = arith.select %12, %3, %13 : vector<64x128xi1>, vector<64x128xf32>
    %c0_3 = arith.constant 0 : index
    %c0_4 = arith.constant 0 : index
    %15 = vector.load %arg7[%c0_3, %c0_4] : memref<64x128xf32, #tpu.memory_space<vmem>>, vector<64x128xf32>
    %16 = arith.truncf %14 : vector<64x128xf32> to vector<64x128xbf16>
    %c0_5 = arith.constant 0 : index
    %c0_6 = arith.constant 0 : index
    %17 = vector.load %arg4[%c0_5, %c0_6] : memref<128x128xbf16, #tpu.memory_space<vmem>>, vector<128x128xbf16>
    %cst = arith.constant dense<0.000000e+00> : vector<64x128xf32>
    %18 = tpu.matmul %16, %17, %cst {dimension_numbers = #tpu.dot_dimension_numbers<[1], [0], [0], [1], [0, 0, 1, 1], [], []>} : vector<64x128xbf16>, vector<128x128xbf16>, vector<64x128xf32> -> vector<64x128xf32>
    %19 = arith.addf %15, %18 : vector<64x128xf32>
    %c0_7 = arith.constant 0 : index
    %c0_8 = arith.constant 0 : index
    %20 = vector.load %arg7[%c0_7, %c0_8] : memref<64x128xf32, #tpu.memory_space<vmem>>, vector<64x128xf32>
    tpu.vector_store %arg7[%c0_7, %c0_8], %19 {strides = array<i32>} : memref<64x128xf32, #tpu.memory_space<vmem>>, vector<64x128xf32>,
    %c0_i32_9 = arith.constant 0 : i32
    %21 = arith.cmpi eq, %arg2, %c0_i32_9 : i32
    %22 = arith.extui %21 : i1 to i32
    %c0_i32_10 = arith.constant 0 : i32
    %23 = arith.cmpi ne, %22, %c0_i32_10 : i32
    scf.if %23 {
      %c0_11 = arith.constant 0 : index
      %c0_12 = arith.constant 0 : index
      %24 = vector.load %arg7[%c0_11, %c0_12] : memref<64x128xf32, #tpu.memory_space<vmem>>, vector<64x128xf32>
      %c0_13 = arith.constant 0 : index
      %c0_14 = arith.constant 0 : index
      %25 = vector.load %arg5[%c0_13, %c0_14] : memref<1x128xf32, #tpu.memory_space<vmem>>, vector<1x128xf32>
      %26 = vector.broadcast %25 : vector<1x128xf32> to vector<64x128xf32>
      %27 = arith.addf %24, %26 : vector<64x128xf32>
      %c0_15 = arith.constant 0 : index
      %c0_16 = arith.constant 0 : index
      %28 = vector.load %arg6[%c0_15, %c0_16] : memref<64x128xf32, #tpu.memory_space<vmem>>, vector<64x128xf32>
      tpu.vector_store %arg6[%c0_15, %c0_16], %27 {strides = array<i32>} : memref<64x128xf32, #tpu.memory_space<vmem>>, vector<64x128xf32>,
    } else {
    }
    return
  }
  func.func @transform_0(%arg0: i32, %arg1: i32, %arg2: i32) -> (i32, i32) {
    %c0_i32 = arith.constant 0 : i32
    return %arg0, %arg2 : i32, i32
  }
  func.func @transform_1(%arg0: i32, %arg1: i32, %arg2: i32) -> (i32, i32) {
    %c0_i32 = arith.constant 0 : i32
    return %arg2, %arg1 : i32, i32
  }
  func.func @transform_2(%arg0: i32, %arg1: i32, %arg2: i32) -> (i32, i32) {
    %c0_i32 = arith.constant 0 : i32
    %c0_i32_0 = arith.constant 0 : i32
    return %c0_i32, %arg1 : i32, i32
  }
  func.func @transform_3(%arg0: i32, %arg1: i32, %arg2: i32) -> (i32, i32) {
    %c0_i32 = arith.constant 0 : i32
    return %arg0, %arg1 : i32, i32
  }
}

</mosaic_0001>

<bundles_post_ra>
// kernel: graph_convolution.3
= control target key start
LH: loop header
LB: loop body
LE: loop exit
PB: predicated region body
PF: predicated region fallthrough
CT: control target
= control target key end

     0   :  { %v36_v0 = vlaneseq  ;;  %s434_s1 = inlined_call_operand.vmem [shape: bf16[128,128], index: 1, kind: input, shape index: {}]   ;;  %s435_s0 = inlined_call_operand.vmem [shape: f32[64,64], index: 0, kind: input, shape index: {}]   ;;  %s436_s2 = inlined_call_operand.vmem [shape: f32[1,128], index: 2, kind: input, shape index: {}]   ;;  %s437_s3 = inlined_call_operand.vmem [shape: f32[64,128], index: 3, kind: output, shape index: {}]  }
   0x1   :  { %v319_v1 = vld [vmem:[%s434_s1 + $0x38] sm:$0xff]   ;;  %v320_v2 = vld [vmem:[%s434_s1 + $0x30] sm:$0xff]   ;;  %v321_v4 = vld [vmem:[%s434_s1 + $0x28] sm:$0xff]  }
   0x2   :  { %279 = vmatprep.subr.bf16.mxu0 %v319_v1  ;;  %303 = vmatprep.subr.bf16.mxu1 %v319_v1  ;;  %v37_v3 = vand.u32 127, %v36_v0  ;;  %v322_v5 = vld [vmem:[%s434_s1 + $0x20] sm:$0xff]   ;;  %v28_v7 = vld [vmem:[%s435_s0 + $0x8] sm:$0xff]  ;;  %v323_v13 = vld [vmem:[%s434_s1 + $0x18] sm:$0xff]  }
   0x3   :  { %280 = vmatpush3.bf16.msra.mxu0 %v319_v1  ;;  %311 = vmatpush3.bf16.msra.mxu1 %v319_v1  ;;  %v27_v6 = vld [vmem:[%s435_s0] sm:$0xff]  ;;  %v32_v10 = vld [vmem:[%s435_s0 + $0x28] sm:$0xff]  ;;  %v324_v14 = vld [vmem:[%s434_s1 + $0x10] sm:$0xff]  }
   0x4   :  { %281 = vmatprep.subr.bf16.mxu0 %v320_v2  ;;  %304 = vmatprep.subr.bf16.mxu1 %v320_v2  ;;  %vm40_vm0 = vcmp.lt.s32.totalorder %v37_v3, 64  ;;  %v255_v8 = vpack.c.bf16 %v28_v7, %v27_v6  ;;  %v31_v9 = vld [vmem:[%s435_s0 + $0x20] sm:$0xff]  ;;  %v325_v15 = vld [vmem:[%s434_s1 + $0x8] sm:$0xff]   ;;  %v29_v17 = vld [vmem:[%s435_s0 + $0x10] sm:$0xff] }
   0x5   :  { %vm371_vm1 = vmpackc.low %vm40_vm0, %vm40_vm0  ;;  %v261_v12 = vpack.c.bf16 %v32_v10, %v31_v9  ;;  %v326_v16 = vld [vmem:[%s434_s1] sm:$0xff]   ;;  %v30_v18 = vld [vmem:[%s435_s0 + $0x18] sm:$0xff] }
   0x6   :  { %295 = vmatprep.mubr.msk.bf16.mxu0 %vm371_vm1, %v255_v8  ;;  %v33_v19 = vld [vmem:[%s435_s0 + $0x30] sm:$0xff]  ;;  %v34_v20 = vld [vmem:[%s435_s0 + $0x38] sm:$0xff]  ;;  %v258_v21 = vpack.c.bf16 %v30_v18, %v29_v17  ;;  %v266_v23 = vld [vmem:[%s436_s2] ss:$0 sm:$0xff] }
   0x7   :  { %282 = vmatpush3.bf16.msra.mxu0 %v320_v2  ;;  %312 = vmatpush3.bf16.msra.mxu1 %v320_v2  ;;  %v264_v22 = vpack.c.bf16 %v34_v20, %v33_v19 }
   0x8   :  { %283 = vmatprep.subr.bf16.mxu0 %v321_v4  ;;  %305 = vmatprep.subr.bf16.mxu1 %v321_v4 }
   0x9   :  { %299 = vmatprep.mubr.msk.bf16.mxu1 %vm371_vm1, %v261_v12 }
   0xb   :  { %284 = vmatpush3.bf16.msra.mxu0 %v321_v4  ;;  %313 = vmatpush3.bf16.msra.mxu1 %v321_v4 }
   0xc   :  { %285 = vmatprep.subr.bf16.mxu0 %v322_v5  ;;  %306 = vmatprep.subr.bf16.mxu1 %v322_v5 }
   0xf   :  { %286 = vmatpush3.bf16.msra.mxu0 %v322_v5  ;;  %314 = vmatpush3.bf16.msra.mxu1 %v322_v5 }
  0x10   :  { %287 = vmatprep.subr.bf16.mxu0 %v323_v13  ;;  %307 = vmatprep.subr.bf16.mxu1 %v323_v13 }
  0x13   :  { %288 = vmatpush3.bf16.msra.mxu0 %v323_v13  ;;  %315 = vmatpush3.bf16.msra.mxu1 %v323_v13 }
  0x14   :  { %289 = vmatprep.subr.bf16.mxu0 %v324_v14  ;;  %308 = vmatprep.subr.bf16.mxu1 %v324_v14 }
  0x17   :  { %290 = vmatpush3.bf16.msra.mxu0 %v324_v14  ;;  %316 = vmatpush3.bf16.msra.mxu1 %v324_v14 }
  0x18   :  { %291 = vmatprep.subr.bf16.mxu0 %v325_v15  ;;  %309 = vmatprep.subr.bf16.mxu1 %v325_v15 }
  0x1b   :  { %292 = vmatpush3.bf16.msra.mxu0 %v325_v15  ;;  %317 = vmatpush3.bf16.msra.mxu1 %v325_v15 }
  0x1c   :  { %293 = vmatprep.subr.bf16.mxu0 %v326_v16  ;;  %310 = vmatprep.subr.bf16.mxu1 %v326_v16 }
  0x1f   :  { %294 = vmatpush3.bf16.msra.mxu0 %v326_v16  ;;  %318 = vmatpush3.bf16.msra.mxu1 %v326_v16 }
  0x22   :  { %296 = vmatmul.mubr.msk.bf16.vlgmr.msra.gmra.mxu0 %vm371_vm1, %v258_v21  ;;  %300 = vmatmul.mubr.msk.bf16.vlgmr.msra.gmra.mxu1 %vm371_vm1, %v264_v22 }
  0xe2   :  { %v297_v24 = vpop.f32.mrf.mxu0  ;;  %v301_v25 = vpop.f32.mrf.mxu1 }
  0xe3   :  { %v228_v26 = vadd.f32 %v297_v24, %v266_v23  ;;  %v232_v27 = vadd.f32 %v301_v25, %v266_v23 }
  0xe4   :  { %v161_v28 = vpop.f32.mrf.mxu0  ;;  %v177_v29 = vpop.f32.mrf.mxu1 }
  0xe5   :  { %236 = vst [vmem:[%s437_s3 + $0x10] sm:$0xff] %v228_v26  ;;  %240 = vst [vmem:[%s437_s3 + $0x30] sm:$0xff] %v232_v27  ;;  %v226_v30 = vadd.f32 %v266_v23, %v161_v28  ;;  %v230_v31 = vadd.f32 %v266_v23, %v177_v29 }
  0xe6   :  { %v298_v32 = vpop.f32.mrf.mxu0  ;;  %v302_v33 = vpop.f32.mrf.mxu1 }
  0xe7   :  { %234 = vst [vmem:[%s437_s3] sm:$0xff] %v226_v30  ;;  %238 = vst [vmem:[%s437_s3 + $0x20] sm:$0xff] %v230_v31  ;;  %v229_v34 = vadd.f32 %v298_v32, %v266_v23  ;;  %v233_v35 = vadd.f32 %v302_v33, %v266_v23 }
  0xe8   :  { %v164_v36 = vpop.f32.mrf.mxu0  ;;  %v180_v37 = vpop.f32.mrf.mxu1 }
  0xe9   :  { %237 = vst [vmem:[%s437_s3 + $0x18] sm:$0xff] %v229_v34  ;;  %241 = vst [vmem:[%s437_s3 + $0x38] sm:$0xff] %v233_v35  ;;  %v227_v38 = vadd.f32 %v266_v23, %v164_v36  ;;  %v231_v39 = vadd.f32 %v266_v23, %v180_v37 }
  0xeb   :  { %235 = vst [vmem:[%s437_s3 + $0x8] sm:$0xff] %v227_v38  ;;  %239 = vst [vmem:[%s437_s3 + $0x28] sm:$0xff] %v231_v39 }

// kernel: graph_convolution.2
= control target key start
LH: loop header
LB: loop body
LE: loop exit
PB: predicated region body
PF: predicated region fallthrough
CT: control target
= control target key end

     0   :  { %s670_s1 = inlined_call_operand.vmem [shape: bf16[128,128], index: 1, kind: input, shape index: {}]   ;;  %s671_s0 = inlined_call_operand.vmem [shape: bf16[128,128], index: 0, kind: input, shape index: {}]   ;;  %s672_s2 = inlined_call_operand.vmem [shape: bf16[128,128], index: 2, kind: output, shape index: {}]  }
   0x1   :  { %v567_v0 = vld [vmem:[%s670_s1 + $0x38] sm:$0xff]   ;;  %v568_v1 = vld [vmem:[%s670_s1 + $0x30] sm:$0xff]   ;;  %v569_v2 = vld [vmem:[%s670_s1 + $0x28] sm:$0xff]  }
   0x2   :  { %519 = vmatprep.subr.bf16.mxu0 %v567_v0  ;;  %551 = vmatprep.subr.bf16.mxu1 %v567_v0  ;;  %v570_v3 = vld [vmem:[%s670_s1 + $0x20] sm:$0xff]   ;;  %v571_v6 = vld [vmem:[%s670_s1 + $0x18] sm:$0xff]   ;;  %v572_v7 = vld [vmem:[%s670_s1 + $0x10] sm:$0xff]  }
   0x3   :  { %520 = vmatpush3.bf16.msra.mxu0 %v567_v0  ;;  %559 = vmatpush3.bf16.msra.mxu1 %v567_v0  ;;  %v575_v4 = vld [vmem:[%s671_s0] sm:$0xff]   ;;  %v573_v8 = vld [vmem:[%s670_s1 + $0x8] sm:$0xff]   ;;  %v579_v12 = vld [vmem:[%s671_s0 + $0x10] sm:$0xff]  }
   0x4   :  { %521 = vmatprep.subr.bf16.mxu0 %v568_v1  ;;  %552 = vmatprep.subr.bf16.mxu1 %v568_v1  ;;  %v576_v5 = vld [vmem:[%s671_s0 + $0x20] sm:$0xff]   ;;  %v577_v10 = vld [vmem:[%s671_s0 + $0x8] sm:$0xff]   ;;  %v580_v13 = vld [vmem:[%s671_s0 + $0x30] sm:$0xff]  }
   0x5   :  { %535 = vmatprep.mubr.bf16.mxu0 %v575_v4  ;;  %543 = vmatprep.mubr.bf16.mxu1 %v576_v5  ;;  %v574_v9 = vld [vmem:[%s670_s1] sm:$0xff]   ;;  %v578_v11 = vld [vmem:[%s671_s0 + $0x28] sm:$0xff]   ;;  %v581_v14 = vld [vmem:[%s671_s0 + $0x18] sm:$0xff]  }
   0x6   :  { %v582_v15 = vld [vmem:[%s671_s0 + $0x38] sm:$0xff]  }
   0x7   :  { %522 = vmatpush3.bf16.msra.mxu0 %v568_v1  ;;  %560 = vmatpush3.bf16.msra.mxu1 %v568_v1 }
   0x8   :  { %523 = vmatprep.subr.bf16.mxu0 %v569_v2  ;;  %553 = vmatprep.subr.bf16.mxu1 %v569_v2 }
   0xb   :  { %524 = vmatpush3.bf16.msra.mxu0 %v569_v2  ;;  %561 = vmatpush3.bf16.msra.mxu1 %v569_v2 }
   0xc   :  { %525 = vmatprep.subr.bf16.mxu0 %v570_v3  ;;  %554 = vmatprep.subr.bf16.mxu1 %v570_v3 }
   0xf   :  { %526 = vmatpush3.bf16.msra.mxu0 %v570_v3  ;;  %562 = vmatpush3.bf16.msra.mxu1 %v570_v3 }
  0x10   :  { %527 = vmatprep.subr.bf16.mxu0 %v571_v6  ;;  %555 = vmatprep.subr.bf16.mxu1 %v571_v6 }
  0x13   :  { %528 = vmatpush3.bf16.msra.mxu0 %v571_v6  ;;  %563 = vmatpush3.bf16.msra.mxu1 %v571_v6 }
  0x14   :  { %529 = vmatprep.subr.bf16.mxu0 %v572_v7  ;;  %556 = vmatprep.subr.bf16.mxu1 %v572_v7 }
  0x17   :  { %530 = vmatpush3.bf16.msra.mxu0 %v572_v7  ;;  %564 = vmatpush3.bf16.msra.mxu1 %v572_v7 }
  0x18   :  { %531 = vmatprep.subr.bf16.mxu0 %v573_v8  ;;  %557 = vmatprep.subr.bf16.mxu1 %v573_v8 }
  0x1b   :  { %532 = vmatpush3.bf16.msra.mxu0 %v573_v8  ;;  %565 = vmatpush3.bf16.msra.mxu1 %v573_v8 }
  0x1c   :  { %533 = vmatprep.subr.bf16.mxu0 %v574_v9  ;;  %558 = vmatprep.subr.bf16.mxu1 %v574_v9 }
  0x1f   :  { %534 = vmatpush3.bf16.msra.mxu0 %v574_v9  ;;  %566 = vmatpush3.bf16.msra.mxu1 %v574_v9 }
  0x22   :  { %536 = vmatmul.mubr.bf16.vlgmr.msra.gmra.mxu0 %v577_v10  ;;  %544 = vmatmul.mubr.bf16.vlgmr.msra.gmra.mxu1 %v578_v11 }
  0x23   :  { %539 = vmatprep.mubr.bf16.mxu0 %v579_v12  ;;  %547 = vmatprep.mubr.bf16.mxu1 %v580_v13 }
  0x2a   :  { %540 = vmatmul.mubr.bf16.gmra.mxu0 %v581_v14  ;;  %548 = vmatmul.mubr.bf16.gmra.mxu1 %v582_v15 }
  0xe2   :  { %v537_v16 = vpop.f32.mrf.mxu0  ;;  %v545_v17 = vpop.f32.mrf.mxu1 }
  0xe4   :  { %v210_v18 = vpop.f32.mrf.mxu0  ;;  %v242_v19 = vpop.f32.mrf.mxu1 }
  0xe6   :  { %v538_v20 = vpop.f32.mrf.mxu0  ;;  %v546_v21 = vpop.f32.mrf.mxu1 }
  0xe7   :  { %v464_v22 = vpack.c.bf16 %v538_v20, %v537_v16  ;;  %v484_v23 = vpack.c.bf16 %v546_v21, %v545_v17 }
  0xe8   :  { %v213_v24 = vpop.f32.mrf.mxu0  ;;  %v245_v25 = vpop.f32.mrf.mxu1 }
  0xe9   :  { %496 = vst [vmem:[%s672_s2 + $0x8] sm:$0xff] %v464_v22   ;;  %500 = vst [vmem:[%s672_s2 + $0x28] sm:$0xff] %v484_v23   ;;  %v459_v26 = vpack.c.bf16 %v213_v24, %v210_v18  ;;  %v479_v27 = vpack.c.bf16 %v245_v25, %v242_v19 }
  0xea   :  { %v541_v28 = vpop.f32.mrf.mxu0  ;;  %v549_v29 = vpop.f32.mrf.mxu1 }
  0xeb   :  { %460 = vst [vmem:[%s672_s2] sm:$0xff] %v459_v26   ;;  %499 = vst [vmem:[%s672_s2 + $0x20] sm:$0xff] %v479_v27  }
  0xec   :  { %v226_v30 = vpop.f32.mrf.mxu0  ;;  %v258_v31 = vpop.f32.mrf.mxu1 }
  0xee   :  { %v542_v32 = vpop.f32.mrf.mxu0  ;;  %v550_v33 = vpop.f32.mrf.mxu1 }
  0xef   :  { %v474_v34 = vpack.c.bf16 %v542_v32, %v541_v28  ;;  %v494_v35 = vpack.c.bf16 %v550_v33, %v549_v29 }
  0xf0   :  { %v229_v36 = vpop.f32.mrf.mxu0  ;;  %v261_v37 = vpop.f32.mrf.mxu1 }
  0xf1   :  { %498 = vst [vmem:[%s672_s2 + $0x18] sm:$0xff] %v474_v34   ;;  %502 = vst [vmem:[%s672_s2 + $0x38] sm:$0xff] %v494_v35   ;;  %v469_v38 = vpack.c.bf16 %v229_v36, %v226_v30  ;;  %v489_v39 = vpack.c.bf16 %v261_v37, %v258_v31 }
  0xf3   :  { %497 = vst [vmem:[%s672_s2 + $0x10] sm:$0xff] %v469_v38   ;;  %501 = vst [vmem:[%s672_s2 + $0x30] sm:$0xff] %v489_v39  }

</bundles_post_ra>
